<compile_context>
chip_gen: v6e
topology: v6e:2x2x1
jax: 0.10.0
libtpu: 0.0.40
codegen_flags: <defaults>
</compile_context>

<pallas_src>
import jax
import jax.numpy as jnp
from jax.experimental import pallas as pl
from jax.experimental.pallas import tpu as pltpu

SLAB = 128  # one vreg lane width; per-slab h is [hidden, SLAB] = 16 vregs for hidden=128


def policy_net_kernel(xT_ref, w1_ref, b1_ref, w2T_ref, b2_ref, outT_ref):
    # Per grid step (batch on the lane axis everywhere):
    #   xT   : [state_dim, tb]       input tile (pipelined)
    #   w1   : [hidden, state_dim]   resident (PyTorch layout)
    #   b1   : [hidden, 1]           resident
    #   w2T  : [hidden, action_dim]  resident (w2 transposed: column a = action-a row)
    #   b2   : [action_dim, 1]       resident
    #   outT : [action_dim, tb]      lane-dense output tile
    state_dim, tb = xT_ref.shape
    hidden_dim, action_dim = w2T_ref.shape
    num_slabs = tb // SLAB  # tb is a multiple of 128 by construction in the wrapper

    w1 = w1_ref[...]            # [hidden, state_dim]
    b1 = b1_ref[...]            # [hidden, 1]
    w2T = w2T_ref[...]          # [hidden, action_dim]
    b2 = b2_ref[...]            # [action_dim, 1]

    if action_dim == 2:
        # 2-way softmax == sigmoid(logit0 - logit1): one contraction row and no
        # cross-sublane max/sum epilogue.  Hoisted once per grid step.
        w2d = w2T[:, 0:1] - w2T[:, 1:2]     # [hidden, 1]
        b2d = b2[0:1, :] - b2[1:2, :]       # [1, 1]

    # Fused fc1 -> ReLU -> fc2 -> softmax per 128-lane batch slab; h stays in vregs.
    # Static unroll: num_slabs <= 4 for the default block_batch.
    for s in range(num_slabs):
        col = s * SLAB
        xs = xT_ref[:, col:col + SLAB]                       # [state_dim, SLAB]

        # fc1 + ReLU on the VPU (K = state_dim is far too small for the MXU); bias is
        # the accumulator init.  All math is exact f32 (no bf16 MXU passes).
        h = jnp.broadcast_to(b1, (hidden_dim, SLAB))
        for k in range(state_dim):                           # static unroll, tiny K
            h = h + w1[:, k:k + 1] * xs[k:k + 1, :]
        h = jnp.maximum(h, 0.0)                              # [hidden, SLAB]

        if action_dim == 2:
            # Logit difference via VPU multiply + cross-sublane (XLU) reduce.
            d = jnp.sum(w2d * h, axis=0, keepdims=True) + b2d        # [1, SLAB]
            # Numerically stable two-class softmax (exp argument always <= 0),
            # exact division so probabilities sum to 1 tightly.
            ed = jnp.exp(-jnp.abs(d))
            p_big = 1.0 / (1.0 + ed)          # prob of the larger logit
            p_small = ed * p_big              # == ed / (1 + ed)
            p0 = jnp.where(d >= 0.0, p_big, p_small)
            p1 = jnp.where(d >= 0.0, p_small, p_big)
            outT_ref[0:1, col:col + SLAB] = p0.astype(outT_ref.dtype)
            outT_ref[1:2, col:col + SLAB] = p1.astype(outT_ref.dtype)
        else:
            # General path (traced only when action_dim != 2): per-action VPU
            # contraction rows + stable softmax, row-wise stores (no concatenate).
            logits = [jnp.sum(w2T[:, a:a + 1] * h, axis=0, keepdims=True) + b2[a:a + 1, :]
                      for a in range(action_dim)]            # action_dim x [1, SLAB]
            m = logits[0]
            for a in range(1, action_dim):
                m = jnp.maximum(m, logits[a])
            exps = [jnp.exp(l - m) for l in logits]
            denom = exps[0]
            for a in range(1, action_dim):
                denom = denom + exps[a]
            inv = 1.0 / denom                                # exact division
            for a in range(action_dim):
                outT_ref[a:a + 1, col:col + SLAB] = (exps[a] * inv).astype(outT_ref.dtype)


def _round_up(x, m):
    return (x + m - 1) // m * m


def policy_net_forward(x, w1, b1, w2, b2, *, block_batch=512):
    """x: [B, state_dim]; w1: [hidden, state_dim]; b1: [hidden];
    w2: [action_dim, hidden]; b2: [action_dim].  Returns probs: [B, action_dim]."""
    B, state_dim = x.shape
    hidden_dim = w1.shape[0]
    action_dim = w2.shape[0]

    # Batch tile = lane axis of every block -> multiple of 128.  Sized so the grid has
    # >= 2 steps whenever B > 128 (v7x megacore), capped at block_batch.  No wrapper
    # padding: Pallas masks the ragged last block (all kernel math is per-column, so
    # garbage lanes in the last input block never leak into valid outputs).
    tb = max(SLAB, min(_round_up(block_batch, SLAB), _round_up(pl.cdiv(B, 2), SLAB)))
    grid = pl.cdiv(B, tb)

    xT = x.T                             # [state_dim, B]  (tiny; the only input reshuffle)
    w2T = w2.T                           # [hidden, action_dim]
    b1c = b1.reshape(hidden_dim, 1)
    b2c = b2.reshape(action_dim, 1)

    cost = pl.CostEstimate(
        flops=2 * B * (state_dim * hidden_dim + hidden_dim * action_dim),
        transcendentals=B * action_dim,
        bytes_accessed=4 * (B * state_dim + B * action_dim
                            + hidden_dim * (state_dim + action_dim + 1) + action_dim),
    )

    outT = pl.pallas_call(
        policy_net_kernel,
        out_shape=jax.ShapeDtypeStruct((action_dim, B), jnp.float32),
        grid_spec=pltpu.PrefetchScalarGridSpec(
            num_scalar_prefetch=0,
            grid=(grid,),
            in_specs=[
                pl.BlockSpec((state_dim, tb), lambda i: (0, i)),           # x tile (pipelined)
                pl.BlockSpec((hidden_dim, state_dim), lambda i: (0, 0)),   # w1 resident
                pl.BlockSpec((hidden_dim, 1), lambda i: (0, 0)),           # b1 resident
                pl.BlockSpec((hidden_dim, action_dim), lambda i: (0, 0)),  # w2^T resident
                pl.BlockSpec((action_dim, 1), lambda i: (0, 0)),           # b2 resident
            ],
            out_specs=pl.BlockSpec((action_dim, tb), lambda i: (0, i)),    # lane-dense out
        ),
        compiler_params=pltpu.CompilerParams(
            dimension_semantics=("parallel",),   # megacore sharding on v7x
        ),
        cost_estimate=cost,
    )(xT, w1, b1c, w2T, b2c)

    # PyTorch-facing layout; a consumer working in transposed layout can use outT as-is.
    return outT.T


def init_params(key, state_dim, hidden_dim, action_dim):
    # PyTorch Linear-style init U(-1/sqrt(fan_in), 1/sqrt(fan_in)), PyTorch weight layout.
    k1, k2, k3, k4 = jax.random.split(key, 4)
    bound1 = 1.0 / float(state_dim) ** 0.5
    bound2 = 1.0 / float(hidden_dim) ** 0.5
    w1 = jax.random.uniform(k1, (hidden_dim, state_dim), jnp.float32, -bound1, bound1)
    b1 = jax.random.uniform(k2, (hidden_dim,), jnp.float32, -bound1, bound1)
    w2 = jax.random.uniform(k3, (action_dim, hidden_dim), jnp.float32, -bound2, bound2)
    b2 = jax.random.uniform(k4, (action_dim,), jnp.float32, -bound2, bound2)
    return w1, b1, w2, b2


if __name__ == "__main__":
    # CartPole-v0 PolicyNet dims: state_dim=4, hidden_dim=128, action_dim=2.
    state_dim, hidden_dim, action_dim = 4, 128, 2
    batch = 200  # small; not a multiple of 128 -> exercises ragged last block + 2-step grid

    key = jax.random.PRNGKey(0)
    kx, kp = jax.random.split(key)
    x = jax.random.normal(kx, (batch, state_dim), dtype=jnp.float32)
    w1, b1, w2, b2 = init_params(kp, state_dim, hidden_dim, action_dim)

    fwd = jax.jit(policy_net_forward, static_argnames=("block_batch",))
    probs = jax.block_until_ready(fwd(x, w1, b1, w2, b2))

    # Pure-JAX reference (PyTorch semantics).  Precision.HIGHEST so the reference matmuls
    # don't go through the TPU's default bf16-pass f32 matmul (the source of the previous
    # >1e-3 mismatch); the kernel itself is exact f32 VPU math.
    hp = jax.lax.Precision.HIGHEST
    h_ref = jnp.maximum(jnp.dot(x, w1.T, precision=hp) + b1[None, :], 0.0)
    ref = jax.nn.softmax(jnp.dot(h_ref, w2.T, precision=hp) + b2[None, :], axis=1)

    assert probs.shape == (batch, action_dim)
    assert bool(jnp.all(jnp.isfinite(probs)))
    err = float(jnp.max(jnp.abs(probs - ref)))
    assert err < 1e-4, f"mismatch vs reference: max abs err = {err}"
    assert bool(jnp.allclose(jnp.sum(probs, axis=1), 1.0, atol=1e-5))

    print("KERNEL_OK")
</pallas_src>

<mosaic_0001>
module attributes {stable_mosaic.version = 11 : i64} {
  func.func @policy_net_kernel(%arg0: i32, %arg1: memref<4x128xf32, #tpu.memory_space<vmem>>, %arg2: memref<128x4xf32, #tpu.memory_space<vmem>>, %arg3: memref<128x1xf32, #tpu.memory_space<vmem>>, %arg4: memref<128x2xf32, #tpu.memory_space<vmem>>, %arg5: memref<2x1xf32, #tpu.memory_space<vmem>>, %arg6: memref<2x128xf32, #tpu.memory_space<vmem>>) attributes {dimension_semantics = [#tpu.dimension_semantics<parallel>], iteration_bounds = array<i64: 2>, scalar_prefetch = 0 : i64, scratch_operands = 0 : i64, tpu.core_type = #tpu.core_type<tc>, window_params = [{transform_indices = @transform_0, window_bounds = array<i64: 4, 128>}, {pipeline_mode = #tpu.pipeline_mode<synchronous>, transform_indices = @transform_1, window_bounds = array<i64: 128, 4>}, {pipeline_mode = #tpu.pipeline_mode<synchronous>, transform_indices = @transform_2, window_bounds = array<i64: 128, 1>}, {pipeline_mode = #tpu.pipeline_mode<synchronous>, transform_indices = @transform_3, window_bounds = array<i64: 128, 2>}, {pipeline_mode = #tpu.pipeline_mode<synchronous>, transform_indices = @transform_4, window_bounds = array<i64: 2, 1>}, {transform_indices = @transform_5, window_bounds = array<i64: 2, 128>}]} {
    %c0 = arith.constant 0 : index
    %c0_0 = arith.constant 0 : index
    %0 = vector.load %arg2[%c0, %c0_0] : memref<128x4xf32, #tpu.memory_space<vmem>>, vector<128x4xf32>
    %c0_1 = arith.constant 0 : index
    %c0_2 = arith.constant 0 : index
    %1 = vector.load %arg3[%c0_1, %c0_2] : memref<128x1xf32, #tpu.memory_space<vmem>>, vector<128x1xf32>
    %c0_3 = arith.constant 0 : index
    %c0_4 = arith.constant 0 : index
    %2 = vector.load %arg4[%c0_3, %c0_4] : memref<128x2xf32, #tpu.memory_space<vmem>>, vector<128x2xf32>
    %c0_5 = arith.constant 0 : index
    %c0_6 = arith.constant 0 : index
    %3 = vector.load %arg5[%c0_5, %c0_6] : memref<2x1xf32, #tpu.memory_space<vmem>>, vector<2x1xf32>
    %4 = vector.extract_strided_slice %2 {offsets = [0, 0], sizes = [128, 1], strides = [1, 1]} : vector<128x2xf32> to vector<128x1xf32>
    %5 = vector.extract_strided_slice %2 {offsets = [0, 1], sizes = [128, 1], strides = [1, 1]} : vector<128x2xf32> to vector<128x1xf32>
    %6 = arith.subf %4, %5 : vector<128x1xf32>
    %7 = vector.extract_strided_slice %3 {offsets = [0, 0], sizes = [1, 1], strides = [1, 1]} : vector<2x1xf32> to vector<1x1xf32>
    %8 = vector.extract_strided_slice %3 {offsets = [1, 0], sizes = [1, 1], strides = [1, 1]} : vector<2x1xf32> to vector<1x1xf32>
    %9 = arith.subf %7, %8 : vector<1x1xf32>
    %c0_7 = arith.constant 0 : index
    %c0_8 = arith.constant 0 : index
    %10 = vector.load %arg1[%c0_7, %c0_8] : memref<4x128xf32, #tpu.memory_space<vmem>>, vector<4x128xf32>
    %11 = vector.shape_cast %1 : vector<128x1xf32> to vector<128x1xf32>
    %12 = vector.broadcast %11 : vector<128x1xf32> to vector<128x128xf32>
    %13 = vector.extract_strided_slice %0 {offsets = [0, 0], sizes = [128, 1], strides = [1, 1]} : vector<128x4xf32> to vector<128x1xf32>
    %14 = vector.extract_strided_slice %10 {offsets = [0, 0], sizes = [1, 128], strides = [1, 1]} : vector<4x128xf32> to vector<1x128xf32>
    %15 = vector.broadcast %13 : vector<128x1xf32> to vector<128x128xf32>
    %16 = vector.broadcast %14 : vector<1x128xf32> to vector<128x128xf32>
    %17 = arith.mulf %15, %16 : vector<128x128xf32>
    %18 = arith.addf %12, %17 : vector<128x128xf32>
    %19 = vector.extract_strided_slice %0 {offsets = [0, 1], sizes = [128, 1], strides = [1, 1]} : vector<128x4xf32> to vector<128x1xf32>
    %20 = vector.extract_strided_slice %10 {offsets = [1, 0], sizes = [1, 128], strides = [1, 1]} : vector<4x128xf32> to vector<1x128xf32>
    %21 = vector.broadcast %19 : vector<128x1xf32> to vector<128x128xf32>
    %22 = vector.broadcast %20 : vector<1x128xf32> to vector<128x128xf32>
    %23 = arith.mulf %21, %22 : vector<128x128xf32>
    %24 = arith.addf %18, %23 : vector<128x128xf32>
    %25 = vector.extract_strided_slice %0 {offsets = [0, 2], sizes = [128, 1], strides = [1, 1]} : vector<128x4xf32> to vector<128x1xf32>
    %26 = vector.extract_strided_slice %10 {offsets = [2, 0], sizes = [1, 128], strides = [1, 1]} : vector<4x128xf32> to vector<1x128xf32>
    %27 = vector.broadcast %25 : vector<128x1xf32> to vector<128x128xf32>
    %28 = vector.broadcast %26 : vector<1x128xf32> to vector<128x128xf32>
    %29 = arith.mulf %27, %28 : vector<128x128xf32>
    %30 = arith.addf %24, %29 : vector<128x128xf32>
    %31 = vector.extract_strided_slice %0 {offsets = [0, 3], sizes = [128, 1], strides = [1, 1]} : vector<128x4xf32> to vector<128x1xf32>
    %32 = vector.extract_strided_slice %10 {offsets = [3, 0], sizes = [1, 128], strides = [1, 1]} : vector<4x128xf32> to vector<1x128xf32>
    %33 = vector.broadcast %31 : vector<128x1xf32> to vector<128x128xf32>
    %34 = vector.broadcast %32 : vector<1x128xf32> to vector<128x128xf32>
    %35 = arith.mulf %33, %34 : vector<128x128xf32>
    %36 = arith.addf %30, %35 : vector<128x128xf32>
    %cst = arith.constant 0.000000e+00 : f32
    %37 = vector.broadcast %cst : f32 to vector<128x128xf32>
    %38 = arith.maximumf %36, %37 : vector<128x128xf32>
    %39 = vector.broadcast %6 : vector<128x1xf32> to vector<128x128xf32>
    %40 = arith.mulf %39, %38 : vector<128x128xf32>
    %cst_9 = arith.constant dense<0.000000e+00> : vector<128xf32>
    %41 = vector.multi_reduction <add>, %40, %cst_9 [0] : vector<128x128xf32> to vector<128xf32>
    %42 = vector.shape_cast %41 : vector<128xf32> to vector<1x128xf32>
    %43 = vector.broadcast %9 : vector<1x1xf32> to vector<1x128xf32>
    %44 = arith.addf %42, %43 : vector<1x128xf32>
    %45 = math.absf %44 : vector<1x128xf32>
    %cst_10 = arith.constant 0.000000e+00 : f32
    %46 = vector.broadcast %cst_10 : f32 to vector<1x128xf32>
    %47 = arith.subf %46, %45 : vector<1x128xf32>
    %48 = math.exp %47 : vector<1x128xf32>
    %cst_11 = arith.constant 1.000000e+00 : f32
    %49 = vector.broadcast %cst_11 : f32 to vector<1x128xf32>
    %50 = arith.addf %49, %48 : vector<1x128xf32>
    %cst_12 = arith.constant 1.000000e+00 : f32
    %51 = vector.broadcast %cst_12 : f32 to vector<1x128xf32>
    %52 = arith.divf %51, %50 : vector<1x128xf32>
    %53 = arith.mulf %48, %52 : vector<1x128xf32>
    %cst_13 = arith.constant 0.000000e+00 : f32
    %54 = vector.broadcast %cst_13 : f32 to vector<1x128xf32>
    %55 = arith.cmpf oge, %44, %54 : vector<1x128xf32>
    %56 = arith.select %55, %52, %53 : vector<1x128xi1>, vector<1x128xf32>
    %cst_14 = arith.constant 0.000000e+00 : f32
    %57 = vector.broadcast %cst_14 : f32 to vector<1x128xf32>
    %58 = arith.cmpf oge, %44, %57 : vector<1x128xf32>
    %59 = arith.select %58, %53, %52 : vector<1x128xi1>, vector<1x128xf32>
    %c0_15 = arith.constant 0 : index
    %c0_16 = arith.constant 0 : index
    %60 = vector.load %arg6[%c0_15, %c0_16] : memref<2x128xf32, #tpu.memory_space<vmem>>, vector<1x128xf32>
    tpu.vector_store %arg6[%c0_15, %c0_16], %56 {strides = array<i32>} : memref<2x128xf32, #tpu.memory_space<vmem>>, vector<1x128xf32>,
    %c1 = arith.constant 1 : index
    %c0_17 = arith.constant 0 : index
    %61 = vector.load %arg6[%c1, %c0_17] : memref<2x128xf32, #tpu.memory_space<vmem>>, vector<1x128xf32>
    tpu.vector_store %arg6[%c1, %c0_17], %59 {strides = array<i32>} : memref<2x128xf32, #tpu.memory_space<vmem>>, vector<1x128xf32>,
    return
  }
  func.func @transform_0(%arg0: i32) -> (i32, i32) {
    %c0_i32 = arith.constant 0 : i32
    %c0_i32_0 = arith.constant 0 : i32
    return %c0_i32, %arg0 : i32, i32
  }
  func.func @transform_1(%arg0: i32) -> (i32, i32) {
    %c0_i32 = arith.constant 0 : i32
    %c0_i32_0 = arith.constant 0 : i32
    %c0_i32_1 = arith.constant 0 : i32
    return %c0_i32, %c0_i32_0 : i32, i32
  }
  func.func @transform_2(%arg0: i32) -> (i32, i32) {
    %c0_i32 = arith.constant 0 : i32
    %c0_i32_0 = arith.constant 0 : i32
    %c0_i32_1 = arith.constant 0 : i32
    return %c0_i32, %c0_i32_0 : i32, i32
  }
  func.func @transform_3(%arg0: i32) -> (i32, i32) {
    %c0_i32 = arith.constant 0 : i32
    %c0_i32_0 = arith.constant 0 : i32
    %c0_i32_1 = arith.constant 0 : i32
    return %c0_i32, %c0_i32_0 : i32, i32
  }
  func.func @transform_4(%arg0: i32) -> (i32, i32) {
    %c0_i32 = arith.constant 0 : i32
    %c0_i32_0 = arith.constant 0 : i32
    %c0_i32_1 = arith.constant 0 : i32
    return %c0_i32, %c0_i32_0 : i32, i32
  }
  func.func @transform_5(%arg0: i32) -> (i32, i32) {
    %c0_i32 = arith.constant 0 : i32
    %c0_i32_0 = arith.constant 0 : i32
    return %c0_i32, %arg0 : i32, i32
  }
}

</mosaic_0001>

<bundles_post_ra>
// kernel: policy_net_forward.1
= control target key start
LH: loop header
LB: loop body
LE: loop exit
PB: predicated region body
PF: predicated region fallthrough
CT: control target
= control target key end

     0   :  { %10 = vsyncpa [#allocation3], 0  ;;  %s1957_s0 = inlined_call_operand.vmem [shape: f32[4,200], index: 0, kind: input, shape index: {}]   ;;  %s1958_s1 = inlined_call_operand.vmem [shape: f32[128,4], index: 1, kind: input, shape index: {}]   ;;  %s1959_s2 = inlined_call_operand.vmem [shape: f32[128,1], index: 2, kind: input, shape index: {}]   ;;  %s1960_s3 = inlined_call_operand.vmem [shape: f32[128,2], index: 3, kind: input, shape index: {}]   ;;  %s1961_s4 = inlined_call_operand.vmem [shape: f32[2,1], index: 4, kind: input, shape index: {}]   ;;  %s1962_s5 = inlined_call_operand.hbm [shape: f32[2,200], index: 5, kind: output, shape index: {}]  }
   0x1   :  { %12 = vsyncpa [#allocation3 + $0x1], 0  ;;  %s1251_s18 = smov 0   ;;  %s1253_s19 = smov 0  }
   0x2   :  { %s1255_s20 = smov 0   ;;  %s1257_s21 = smov 0  }
   0x3 LB: > { %s1272_s22 = sadd.s32 4294967295, %s1213_s21   ;;  %s1075_s23 = sadd.s32 4294967294, %s1213_s21   ;;  %s1213_s21 = sphi %s1257_s21, %s1968_s21   ;;  %s1209_s20 = sphi %s1255_s20, %s1967_s20   ;;  %s1205_s19 = sphi %s1253_s19, %s1966_s19   ;;  %s1201_s18 = sphi %s1251_s18, %s1965_s18  }
   0x4   : > { %s1276_s24 = sadd.s32 1, %s1213_s21   ;;  %s135_s25 = sadd.s32 1, %s1209_s20 }
   0x5   : > { %s132_s26 = ssub.s32 %s1213_s21, %s1276_s24  ;;  %p145_p0 = scmp.ne.s32.totalorder %s1209_s20, %s1205_s19 }
   0x6   : > { %p133_p1 = scmp.eq.s32.totalorder %s132_s26, 0  ;;  %p146_p2 = scmp.eq.s32.totalorder %s1272_s22, 1 }
   0x7   : > { %p151_p3 = scmp.ne.s32.totalorder %s1205_s19, %s1201_s18  ;;  %p152_p4 = scmp.eq.s32.totalorder %s1075_s23, 1 }
   0x8   : > { %s1287_s27 = scalar_select %p133_p1, %s1209_s20, %s135_s25  }
   0x9   : > { %p1289_p5 = por %p146_p2, %p145_p0  ;;  %p1293_p6 = por %p152_p4, %p151_p3 }
   0xa   : > { %p1078_p7 = scmp.ge.s32.totalorder %s1213_s21, 1  ;;  %p189_p8 = scmp.lt.s32.totalorder %s1213_s21, 3 }
   0xc   : > { %p190_p9 = pnand %p1078_p7, %p189_p8 }
   0xd   : > { %s1215_s9 = smov (!%p190_p9), 127   ;;  %p216_p10 = scmp.lt.s32.totalorder (!%p190_p9), %s1272_s22, 1 }
   0xe   : > { %193 = sbr.rel (%p190_p9) target bundleno = 465 (0x1d1), region = 40  ;;  %s213_s15 = sand.u32 (!%p190_p9), 1, %s1205_s19  }
   0xf   : > { %s1082_s16 = sshll.u32 (!%p190_p9), %s1272_s22, 5 }
  0x10   : > { %s1916_s30 = scalar_lea.hbm (!%p190_p9), %s1962_s5, %s1082_s16 }
  0x13   : > { %v1302_v0 = vld [vmem:[%s1960_s3 + $0x10] sm:$0xff]  ;;  %v1307_v1 = vld [vmem:[%s1960_s3] sm:$0xff]  ;;  %v1316_v2 = vld [vmem:[%s1960_s3 + $0x18] sm:$0xff]  ;;  %v1216_v4 = vmov 1   ;;  %v1217_v5 = vmov 0   ;;  %v1218_v34 = vmov 3  }
  0x14   : > { %289 = vrot.lane.b32.xlu1 %v1302_v0, %s1215_s9  ;;  %285 = vrot.lane.b32.xlu0 %v1307_v1, %s1215_s9  ;;  %v1321_v3 = vld [vmem:[%s1960_s3 + $0x8] sm:$0xff]  ;;  %v1337_v7 = vld [vmem:[%s1960_s3 + $0x20] sm:$0xff]  ;;  %v1219_v38 = vmov 2   ;;  %s217_s7 = scalar_select %p216_p10, %s1272_s22, 1 }
  0x15   : > { %1131 = vset.pattern.permute.xlu0 %v1216_v4  ;;  %1129 = vset.pattern.permute.xlu1 %v1217_v5  ;;  %v1332_v6 = vld [vmem:[%s1960_s3 + $0x28] sm:$0xff]  ;;  %v1346_v8 = vld [vmem:[%s1960_s3 + $0x38] sm:$0xff]  ;;  %v1351_v9 = vld [vmem:[%s1960_s3 + $0x30] sm:$0xff]  ;;  %s1003_s22 = scalar_lea.sflag [#allocation3], %s213_s15 }
  0x16   : > { %v1360_v10 = vld [vmem:[%s1960_s3 + $0x48] sm:$0xff]  ;;  %v1365_v11 = vld [vmem:[%s1960_s3 + $0x40] sm:$0xff]  ;;  %v1374_v12 = vld [vmem:[%s1960_s3 + $0x58] sm:$0xff]  ;;  %s1080_s8 = sshll.u32 %s217_s7, 2  ;;  %s1220_s7 = smov [#allocation2]  }
  0x17   : > { %v1379_v13 = vld [vmem:[%s1960_s3 + $0x50] sm:$0xff]  ;;  %v1388_v14 = vld [vmem:[%s1960_s3 + $0x68] sm:$0xff]  ;;  %v1393_v15 = vld [vmem:[%s1960_s3 + $0x60] sm:$0xff]  ;;  %s219_s12 = scalar_lea.vmem %s1957_s0, %s1080_s8  ;;  %s1157_s8 = sshll.u32 %s1220_s7, 4  ;;  %s1158_s8 = int_to_ptr.vmem [resolvable:$false] %s1157_s8 }
  0x18   : > { %291 = vrot.lane.b32.xlu1 %v1316_v2, %s1215_s9  ;;  %287 = vrot.lane.b32.xlu0 %v1321_v3, %s1215_s9  ;;  %v1402_v16 = vld [vmem:[%s1960_s3 + $0x78] sm:$0xff]  ;;  %v1407_v17 = vld [vmem:[%s1960_s3 + $0x70] sm:$0xff]  ;;  %s1159_s10 = scalar_lea.vmem %s1158_s8, 64 }
  0x19   : > { %v237_v18 = vld [vmem:[%s1959_s2 + $0x8] sm:$0xff]  ;;  %v238_v20 = vld [vmem:[%s1959_s2 + $0x10] sm:$0xff]  ;;  %v1428_v21 = vld [vmem:[%s1958_s1 + $0x20] sm:$0xff] }
  0x1a   : > { %v1419_v19 = vld [vmem:[%s1958_s1 + $0x8] sm:$0xff]  ;;  %v240_v22 = vld [vmem:[%s1959_s2 + $0x20] sm:$0xff]  ;;  %v1437_v23 = vld [vmem:[%s1958_s1 + $0x30] sm:$0xff] }
  0x1b   : > { %v242_v24 = vld [vmem:[%s1959_s2 + $0x30] sm:$0xff]  ;;  %v1446_v25 = vld [vmem:[%s1958_s1 + $0x40] sm:$0xff]  ;;  %v1486_v35 = vld [vmem:[%s1958_s1 + $0x18] sm:$0xff] }
  0x1c   : > { %295 = vrot.lane.b32.xlu1 %v1332_v6, %s1215_s9  ;;  %293 = vrot.lane.b32.xlu0 %v1337_v7, %s1215_s9  ;;  %v244_v26 = vld [vmem:[%s1959_s2 + $0x40] sm:$0xff]  ;;  %v1455_v27 = vld [vmem:[%s1958_s1 + $0x50] sm:$0xff] }
  0x1d   : > { %v246_v28 = vld [vmem:[%s1959_s2 + $0x50] sm:$0xff]  ;;  %v1464_v29 = vld [vmem:[%s1958_s1 + $0x60] sm:$0xff]  ;;  %v1499_v37 = vld [vmem:[%s1958_s1 + $0x58] sm:$0xff] }
  0x1e   : > { %v248_v30 = vld [vmem:[%s1959_s2 + $0x60] sm:$0xff]  ;;  %v1473_v31 = vld [vmem:[%s1958_s1 + $0x70] sm:$0xff]  ;;  %v1510_v39 = vld [vmem:[%s1958_s1 + $0x28] sm:$0xff] }
  0x1f   : > { %v250_v32 = vld [vmem:[%s1959_s2 + $0x70] sm:$0xff]  ;;  %v220_v33 = vld [vmem:[%s1958_s1] sm:$0xff]  ;;  %v1517_v40 = vld [vmem:[%s1958_s1 + $0x38] sm:$0xff] }
  0x20   : > { %299 = vrot.lane.b32.xlu1 %v1346_v8, %s1215_s9  ;;  %297 = vrot.lane.b32.xlu0 %v1351_v9, %s1215_s9  ;;  %v1492_v36 = vld [vmem:[%s1958_s1 + $0x10] sm:$0xff]  ;;  %v1524_v41 = vld [vmem:[%s1958_s1 + $0x48] sm:$0xff] }
  0x21   : > { %v1531_v42 = vld [vmem:[%s1958_s1 + $0x68] sm:$0xff]  ;;  %v236_v43 = vld [vmem:[%s1959_s2] sm:$0xff]  ;;  %v239_v44 = vld [vmem:[%s1959_s2 + $0x18] sm:$0xff] }
  0x22   : > { %v241_v45 = vld [vmem:[%s1959_s2 + $0x28] sm:$0xff]  ;;  %v243_v48 = vld [vmem:[%s1959_s2 + $0x38] sm:$0xff] }
  0x23   : > { %v245_v51 = vld [vmem:[%s1959_s2 + $0x48] sm:$0xff]  ;;  %v247_v54 = vld [vmem:[%s1959_s2 + $0x58] sm:$0xff] }
  0x24   : > { %303 = vrot.lane.b32.xlu1 %v1360_v10, %s1215_s9  ;;  %301 = vrot.lane.b32.xlu0 %v1365_v11, %s1215_s9  ;;  %v1573_v55 = vld [vmem:[%s1958_s1 + $0x78] sm:$0xff]  ;;  %v249_v58 = vld [vmem:[%s1959_s2 + $0x68] sm:$0xff] }
  0x25   : > { %v251_v60 = vld [vmem:[%s1959_s2 + $0x78] sm:$0xff] }
  0x28   : > { %307 = vrot.lane.b32.xlu1 %v1374_v12, %s1215_s9  ;;  %305 = vrot.lane.b32.xlu0 %v1379_v13, %s1215_s9 }
  0x2c   : > { %311 = vrot.lane.b32.xlu1 %v1388_v14, %s1215_s9  ;;  %309 = vrot.lane.b32.xlu0 %v1393_v15, %s1215_s9 }
  0x30   : > { %315 = vrot.lane.b32.xlu1 %v1402_v16, %s1215_s9  ;;  %313 = vrot.lane.b32.xlu0 %v1407_v17, %s1215_s9  ;;  %s1079_s9 = sshll.u32 %s213_s15, 1 }
  0x31   : > { %s215_s17 = scalar_lea.vmem [#allocation2], %s1079_s9 }
  0x32   : > { %s1016_s23 = sshll.u32 %s215_s17, 4  ;;  %s1918_s23 = int_to_ptr.vmem [resolvable:$true] %s1016_s23 }
  0x33   : > { %s1153_s6 = scalar_lea.vmem %s1918_s23, 32  ;;  %p1160_p0 = scmp.lt.s32.totalorder %s1918_s23, %s1158_s8 }
  0x34   : > { %361 = vperm.xlu1 %1129, %v237_v18   ;;  %555 = vperm.xlu0 %1131, %v1419_v19   ;;  %p1154_p11 = scmp.ne.s32.totalorder %s1918_s23, %s1153_s6  ;;  %p1161_p1 = scmp.lt.s32.totalorder %s1159_s10, %s1153_s6 }
  0x36   : > { %p1155_p12 = pnand %p1154_p11, %p1289_p5  ;;  %p1162_p2 = por %p1161_p1, %p1160_p0 }
  0x38   : > { %366 = vperm.xlu1 %1129, %v238_v20   ;;  %567 = vperm.xlu0 %1131, %v1428_v21   ;;  %p1156_p13 = pneg %p1155_p12 }
  0x3a   : > { %p1163_p3 = pnand %p1162_p2, %p1156_p13 }
  0x3c   : > { %376 = vperm.xlu1 %1129, %v240_v22   ;;  %575 = vperm.xlu0 %1131, %v1437_v23  }
  0x40   : > { %386 = vperm.xlu1 %1129, %v242_v24   ;;  %583 = vperm.xlu0 %1131, %v1446_v25  }
  0x44   : > { %396 = vperm.xlu1 %1129, %v244_v26   ;;  %591 = vperm.xlu0 %1131, %v1455_v27  }
  0x48   : > { %406 = vperm.xlu1 %1129, %v246_v28   ;;  %599 = vperm.xlu0 %1131, %v1464_v29  }
  0x4c   : > { %416 = vperm.xlu1 %1129, %v248_v30   ;;  %607 = vperm.xlu0 %1131, %v1473_v31  }
  0x50   : > { %426 = vperm.xlu1 %1129, %v250_v32   ;;  %1133 = vset.pattern.permute.xlu0 %v1218_v34 }
  0x51   : > { %751 = vperm.xlu0 %1133, %v220_v33  }
  0x54   : > { %436 = vperm.xlu1 %1129, %v220_v33  }
  0x55   : > { %763 = vperm.xlu0 %1133, %v1486_v35  }
  0x58   : > { %446 = vperm.xlu1 %1129, %v1492_v36  }
  0x59   : > { %791 = vperm.xlu0 %1133, %v1455_v27  }
  0x5c   : > { %456 = vperm.xlu1 %1129, %v1428_v21  }
  0x5d   : > { %795 = vperm.xlu0 %1133, %v1499_v37  }
  0x60   : > { %466 = vperm.xlu1 %1129, %v1437_v23  }
  0x61   : > { %1140 = vset.pattern.permute.xlu0 %v1219_v38 }
  0x62   : > { %651 = vperm.xlu0 %1140, %v220_v33  }
  0x64   : > { %476 = vperm.xlu1 %1129, %v1446_v25  }
  0x66   : > { %663 = vperm.xlu0 %1140, %v1486_v35  }
  0x68   : > { %486 = vperm.xlu1 %1129, %v1455_v27  }
  0x6a   : > { %671 = vperm.xlu0 %1140, %v1510_v39  }
  0x6c   : > { %496 = vperm.xlu1 %1129, %v1464_v29  }
  0x6e   : > { %679 = vperm.xlu0 %1140, %v1517_v40  }
  0x70   : > { %506 = vperm.xlu1 %1129, %v1473_v31  }
  0x72   : > { %687 = vperm.xlu0 %1140, %v1524_v41  }
  0x74   : > { %1130 = vset.pattern.permute.xlu1 %v1216_v4 }
  0x75   : > { %551 = vperm.xlu1 %1130, %v220_v33  }
  0x76   : > { %703 = vperm.xlu0 %1140, %v1531_v42  }
  0x79   : > { %559 = vperm.xlu1 %1130, %v1492_v36  }
  0x7a   : > { %707 = vperm.xlu0 %1140, %v1473_v31  }
  0x7d   : > { %563 = vperm.xlu1 %1130, %v1486_v35  }
  0x7e   : > { %1144 = vset.pattern.permute.xlu0 %v1217_v5 }
  0x7f   : > { %356 = vperm.xlu0 %1144, %v236_v43  }
  0x81   : > { %571 = vperm.xlu1 %1130, %v1510_v39  }
  0x83   : > { %371 = vperm.xlu0 %1144, %v239_v44  }
  0x85   : > { %579 = vperm.xlu1 %1130, %v1517_v40  }
  0x86   : > { %v1550_v46 = vpop.permute.xlu1 %289  ;;  %v286_v47 = vpop.permute.xlu0 %285 }
  0x87   : > { %381 = vperm.xlu0 %1144, %v241_v45   ;;  %v333_v43 = vsub.f32 %v1307_v1, %v286_v47  ;;  %v335_v45 = vsub.f32 %v1302_v0, %v1550_v46  ;;  %v514_v46 = vlaneseq }
  0x89   : > { %587 = vperm.xlu1 %1130, %v1524_v41  }
  0x8a   : > { %v1556_v49 = vpop.permute.xlu1 %291  ;;  %v288_v50 = vpop.permute.xlu0 %287 }
  0x8b   : > { %391 = vperm.xlu0 %1144, %v243_v48   ;;  %v336_v1 = vsub.f32 %v1316_v2, %v1556_v49 }
  0x8d   : > { %595 = vperm.xlu1 %1130, %v1499_v37  }
  0x8e   : > { %v1562_v52 = vpop.permute.xlu1 %295  ;;  %v1564_v53 = vpop.permute.xlu0 %293 }
  0x8f   : > { %401 = vperm.xlu0 %1144, %v245_v51   ;;  %v337_v0 = vsub.f32 %v1337_v7, %v1564_v53  ;;  %v338_v2 = vsub.f32 %v1332_v6, %v1562_v52 }
  0x91   : > { %603 = vperm.xlu1 %1130, %v1531_v42  }
  0x92   : > { %v1575_v56 = vpop.permute.xlu0 %297  ;;  %v1577_v57 = vpop.permute.xlu1 %299 }
  0x93   : > { %411 = vperm.xlu0 %1144, %v247_v54   ;;  %v339_v53 = vsub.f32 %v1351_v9, %v1575_v56 }
  0x95   : > { %611 = vperm.xlu1 %1130, %v1573_v55  }
  0x96   : > { %v1583_v59 = vpop.permute.xlu0 %301  ;;  %v1588_v61 = vpop.permute.xlu1 %303 }
  0x97   : > { %421 = vperm.xlu0 %1144, %v249_v58  }
  0x99   : > { %1132 = vset.pattern.permute.xlu1 %v1219_v38 }
  0x9a   : > { %655 = vperm.xlu1 %1132, %v1419_v19   ;;  %v1592_v62 = vpop.permute.xlu0 %305  ;;  %v1595_v63 = vpop.permute.xlu1 %307 }
  0x9b   : > { %431 = vperm.xlu0 %1144, %v251_v60   ;;  %v343_v60 = vsub.f32 %v1379_v13, %v1592_v62  ;;  %v268_v62 = vld [vmem:[%s1961_s4] sm:$0x3] }
  0x9e   : > { %659 = vperm.xlu1 %1132, %v1492_v36   ;;  %v1600_v4 = vpop.permute.xlu0 %309  ;;  %v1602_v18 = vpop.permute.xlu1 %311 }
  0x9f   : > { %441 = vperm.xlu0 %1144, %v1419_v19  }
  0xa2   : > { %667 = vperm.xlu1 %1132, %v1428_v21   ;;  %v1606_v20 = vpop.permute.xlu0 %313  ;;  %v1609_v22 = vpop.permute.xlu1 %315 }
  0xa3   : > { %451 = vperm.xlu0 %1144, %v1486_v35  }
  0xa6   : > { %675 = vperm.xlu1 %1132, %v1437_v23  }
  0xa7   : > { %461 = vperm.xlu0 %1144, %v1510_v39  }
  0xaa   : > { %683 = vperm.xlu1 %1132, %v1446_v25  }
  0xab   : > { %471 = vperm.xlu0 %1144, %v1517_v40  }
  0xae   : > { %691 = vperm.xlu1 %1132, %v1455_v27  }
  0xaf   : > { %v1613_v24 = vpop.permute.xlu1 %361  ;;  %481 = vperm.xlu0 %1144, %v1524_v41   ;;  %v1616_v26 = vpop.permute.xlu0 %555 }
  0xb2   : > { %1134 = vset.pattern.permute.xlu1 %v1218_v34 }
  0xb3   : > { %v1619_v28 = vpop.permute.xlu1 %366  ;;  %491 = vperm.xlu0 %1144, %v1499_v37   ;;  %755 = vperm.xlu1 %1134, %v1419_v19   ;;  %v568_v30 = vpop.permute.xlu0 %567  ;;  %v334_v19 = vsub.f32 %v1321_v3, %v288_v50 }
  0xb7   : > { %v377_v32 = vpop.permute.xlu1 %376  ;;  %501 = vperm.xlu0 %1144, %v1531_v42   ;;  %759 = vperm.xlu1 %1134, %v1492_v36   ;;  %v1625_v27 = vpop.permute.xlu0 %575 }
  0xbb   : > { %v1627_v33 = vpop.permute.xlu1 %386  ;;  %511 = vperm.xlu0 %1144, %v1573_v55   ;;  %767 = vperm.xlu1 %1134, %v1428_v21   ;;  %v1631_v35 = vpop.permute.xlu0 %583 }
  0xbf   : > { %v1635_v44 = vpop.permute.xlu1 %396  ;;  %868 = vperm.xlu0 %1144, %v333_v43   ;;  %1135 = vset.pattern.permute.xlu1 %v1217_v5  ;;  %v1638_v36 = vpop.permute.xlu0 %591 }
  0xc0   : > { %873 = vperm.xlu1 %1135, %v334_v19  }
  0xc3   : > { %v1642_v48 = vpop.permute.xlu1 %406  ;;  %878 = vperm.xlu0 %1144, %v335_v45   ;;  %v1644_v21 = vpop.permute.xlu0 %599  ;;  %v344_v45 = vsub.f32 %v1374_v12, %v1595_v63  ;;  %v345_v12 = vsub.f32 %v1393_v15, %v1600_v4 }
  0xc4   : > { %1136 = vset.pattern.permute.xlu1 %v1218_v34 }
  0xc5   : > { %771 = vperm.xlu1 %1136, %v1510_v39   ;;  %v1666_v39 = vshrl.u32 %v514_v46, 7 }
  0xc7   : > { %v1651_v3 = vpop.permute.xlu1 %416  ;;  %883 = vperm.xlu0 %1144, %v336_v1   ;;  %v1653_v47 = vpop.permute.xlu0 %607  ;;  %v616_v7 = vsub.s32 1, %v1666_v39  ;;  %v516_v6 = vsub.s32 0, %v1666_v39 }
  0xc9   : > { %775 = vperm.xlu1 %1136, %v1437_v23  }
  0xcb   : > { %v1659_v50 = vpop.permute.xlu1 %426  ;;  %888 = vperm.xlu0 %1144, %v337_v0   ;;  %v340_v0 = vsub.f32 %v1346_v8, %v1577_v57  ;;  %v347_v8 = vsub.f32 %v1407_v17, %v1606_v20 }
  0xcc   : > { %v1661_v51 = vpop.permute.xlu0 %751 }
  0xcd   : > { %779 = vperm.xlu1 %1136, %v1517_v40   ;;  %v1680_v40 = vld [vmem:[%s219_s12] sm:$0xf] }
  0xce   : > { %v1685_v54 = vrot.slane %v1680_v40, %v616_v7  ;;  %v1693_v9 = vrot.slane %v1680_v40, %v516_v6 }
  0xcf   : > { %893 = vperm.xlu0 %1144, %v338_v2   ;;  %v1668_v49 = vpop.permute.xlu1 %436  ;;  %v350_v2 = vrot.slane %v268_v62, 1 }
  0xd0   : > { %v1674_v23 = vpop.permute.xlu0 %763  ;;  %v622_v56 = vmul.f32 %v1685_v54, %v568_v30  ;;  %v626_v57 = vmul.f32 %v1685_v54, %v1631_v35  ;;  %v628_v17 = vmul.f32 %v1685_v54, %v1638_v36  ;;  %v341_v35 = vsub.f32 %v1365_v11, %v1583_v59 }
  0xd1   : > { %783 = vperm.xlu1 %1136, %v1446_v25  }
  0xd3   : > { %898 = vperm.xlu0 %1144, %v339_v53   ;;  %v1682_v52 = vpop.permute.xlu1 %446 }
  0xd4   : > { %v1687_v58 = vpop.permute.xlu0 %791 }
  0xd5   : > { %787 = vperm.xlu1 %1136, %v1524_v41  }
  0xd7   : > { %918 = vperm.xlu0 %1144, %v343_v60   ;;  %v457_v25 = vpop.permute.xlu1 %456 }
  0xd8   : > { %v522_v43 = vmul.f32 %v1693_v9, %v457_v25  ;;  %v1697_v19 = vpop.permute.xlu0 %795 }
  0xd9   : > { %1137 = vset.pattern.permute.xlu1 %v1219_v38 }
  0xda   : > { %v538_v1 = vadd.f32 %v522_v43, %v377_v32  ;;  %695 = vperm.xlu1 %1137, %v1499_v37   ;;  %v624_v37 = vmul.f32 %v1685_v54, %v1625_v27 }
  0xdb   : > { %923 = vperm.xlu0 %1144, %v344_v45   ;;  %v467_v13 = vpop.permute.xlu1 %466 }
  0xdc   : > { %v524_v41 = vmul.f32 %v1693_v9, %v467_v13  ;;  %v1707_v30 = vadd.f32 %v622_v56, %v538_v1  ;;  %v630_v1 = vmul.f32 %v1685_v54, %v1644_v21 }
  0xdd   : > { %v1713_v63 = vpop.permute.xlu0 %651 }
  0xde   : > { %v540_v32 = vadd.f32 %v524_v41, %v1627_v33  ;;  %1138 = vset.pattern.permute.xlu1 %v1217_v5  ;;  %v352_v33 = vsub.f32 %v268_v62, %v350_v2  ;;  %v632_v41 = vmul.f32 %v1685_v54, %v1653_v47  ;;  %v716_v62 = vsub.s32 2, %v1666_v39 }
  0xdf   : > { %928 = vperm.xlu0 %1144, %v345_v12   ;;  %903 = vperm.xlu1 %1138, %v340_v0   ;;  %v477_v46 = vpop.permute.xlu1 %476  ;;  %v342_v12 = vsub.f32 %v1360_v10, %v1588_v61  ;;  %v816_v10 = vsub.s32 3, %v1666_v39 }
  0xe0   : > { %v526_v7 = vmul.f32 %v1693_v9, %v477_v46  ;;  %v1720_v53 = vadd.f32 %v624_v37, %v540_v32  ;;  %v520_v37 = vmul.f32 %v1693_v9, %v1682_v52  ;;  %v1768_v46 = vrot.slane %v1680_v40, %v716_v62 }
  0xe1   : > { %v1724_v15 = vpop.permute.xlu0 %663 }
  0xe2   : > { %v542_v4 = vadd.f32 %v526_v7, %v1635_v44 }
  0xe3   : > { %938 = vperm.xlu0 %1144, %v347_v8   ;;  %1139 = vset.pattern.permute.xlu1 %v1219_v38  ;;  %v487_v27 = vpop.permute.xlu1 %486 }
  0xe4   : > { %v528_v6 = vmul.f32 %v1693_v9, %v487_v27  ;;  %699 = vperm.xlu1 %1139, %v1464_v29   ;;  %v1732_v60 = vadd.f32 %v626_v57, %v542_v4  ;;  %v518_v57 = vmul.f32 %v1693_v9, %v1668_v49  ;;  %v718_v27 = vmul.f32 %v1768_v46, %v1713_v63 }
  0xe5   : > { %v1734_v25 = vpop.permute.xlu0 %671 }
  0xe6   : > { %v544_v20 = vadd.f32 %v528_v6, %v1642_v48 }
  0xe7   : > { %985 = vperm.xlu0 %1144, %v352_v33   ;;  %v497_v44 = vpop.permute.xlu1 %496 }
  0xe8   : > { %v530_v56 = vmul.f32 %v1693_v9, %v497_v44  ;;  %1141 = vset.pattern.permute.xlu1 %v1217_v5  ;;  %v1743_v43 = vadd.f32 %v628_v17, %v544_v20 }
  0xe9   : > { %v1745_v45 = vpop.permute.xlu0 %679  ;;  %908 = vperm.xlu1 %1141, %v341_v35  }
  0xea   : > { %v546_v36 = vadd.f32 %v530_v56, %v1651_v3 }
  0xeb   : > { %v507_v48 = vpop.permute.xlu1 %506 }
  0xec   : > { %v532_v13 = vmul.f32 %v1693_v9, %v507_v48  ;;  %v1751_v11 = vadd.f32 %v630_v1, %v546_v36  ;;  %v346_v1 = vsub.f32 %v1388_v14, %v1602_v18  ;;  %v348_v36 = vsub.f32 %v1402_v16, %v1609_v22 }
  0xed   : > { %v1753_v59 = vpop.permute.xlu0 %687  ;;  %1142 = vset.pattern.permute.xlu1 %v1218_v34  ;;  %v619_v16 = vmul.f32 %v1685_v54, %v1616_v26 }
  0xee   : > { %v548_v0 = vadd.f32 %v532_v13, %v1659_v50  ;;  %799 = vperm.xlu1 %1142, %v1464_v29   ;;  %v536_v50 = vadd.f32 %v520_v37, %v1619_v28  ;;  %v1782_v28 = vrot.slane %v1680_v40, %v816_v10 }
  0xf0   : > { %v552_v21 = vpop.permute.xlu1 %551  ;;  %v648_v3 = vadd.f32 %v632_v41, %v548_v0  ;;  %v818_v49 = vmul.f32 %v1782_v28, %v1661_v51 }
  0xf1   : > { %v1765_v32 = vpop.permute.xlu0 %703  ;;  %v618_v39 = vmul.f32 %v1685_v54, %v552_v21 }
  0xf2   : > { %1143 = vset.pattern.permute.xlu1 %v1217_v5 }
  0xf3   : > { %913 = vperm.xlu1 %1143, %v342_v12  }
  0xf4   : > { %v560_v47 = vpop.permute.xlu1 %559 }
  0xf5   : > { %v620_v29 = vmul.f32 %v1685_v54, %v560_v47  ;;  %v708_v2 = vpop.permute.xlu0 %707 }
  0xf6   : > { %v732_v7 = vmul.f32 %v1768_v46, %v708_v2 }
  0xf7   : > { %v636_v61 = vadd.f32 %v620_v29, %v536_v50  ;;  %1145 = vset.pattern.permute.xlu1 %v1218_v34 }
  0xf8   : > { %v1776_v52 = vadd.f32 %v732_v7, %v648_v3  ;;  %803 = vperm.xlu1 %1145, %v1531_v42   ;;  %v564_v8 = vpop.permute.xlu1 %563 }
  0xf9   : > { %v621_v2 = vmul.f32 %v1685_v54, %v564_v8 }
  0xfa   : > { %v357_v4 = vpop.permute.xlu0 %356 }
  0xfb   : > { %v534_v33 = vadd.f32 %v518_v57, %v357_v4  ;;  %v721_v57 = vmul.f32 %v1768_v46, %v1724_v15  ;;  %v723_v15 = vmul.f32 %v1768_v46, %v1734_v25 }
  0xfc   : > { %1146 = vset.pattern.permute.xlu1 %v1219_v38  ;;  %v572_v6 = vpop.permute.xlu1 %571 }
  0xfd   : > { %v634_v17 = vadd.f32 %v618_v39, %v534_v33  ;;  %711 = vperm.xlu1 %1146, %v1573_v55   ;;  %v623_v8 = vmul.f32 %v1685_v54, %v572_v6 }
  0xfe   : > { %v372_v42 = vpop.permute.xlu0 %371 }
  0xff   : > { %v734_v20 = vadd.f32 %v718_v27, %v634_v17 }
 0x100   : > { %v580_v35 = vpop.permute.xlu1 %579 }
 0x101   : > { %1147 = vset.pattern.permute.xlu1 %v1218_v34  ;;  %v1792_v40 = vadd.f32 %v818_v49, %v734_v20 }
 0x102   : > { %v382_v63 = vpop.permute.xlu0 %381  ;;  %807 = vperm.xlu1 %1147, %v1473_v31  }
 0x104   : > { %v1795_v44 = vpop.permute.xlu1 %587 }
 0x106   : > { %v392_v38 = vpop.permute.xlu0 %391  ;;  %811 = vperm.xlu1 %1147, %v1573_v55  }
 0x108   : > { %v1798_v56 = vpop.permute.xlu1 %595 }
 0x10a   : > { %v402_v51 = vpop.permute.xlu0 %401  ;;  %1148 = vset.pattern.permute.xlu1 %v1217_v5 }
 0x10b   : > { %933 = vperm.xlu1 %1148, %v346_v1  }
 0x10c   : > { %v1803_v34 = vpop.permute.xlu1 %603 }
 0x10e   : > { %v1807_v31 = vpop.permute.xlu0 %411 }
 0x10f   : > { %943 = vperm.xlu1 %1148, %v348_v36  }
 0x110   : > { %v1809_v48 = vpop.permute.xlu1 %611 }
 0x112   : > { %v1811_v55 = vpop.permute.xlu0 %421 }
 0x115   : > { %v656_v13 = vpop.permute.xlu1 %655 }
 0x116   : > { %v1813_v41 = vpop.permute.xlu0 %431  ;;  %v719_v37 = vmul.f32 %v1768_v46, %v656_v13 }
 0x119   : > { %v660_v14 = vpop.permute.xlu1 %659 }
 0x11a   : > { %v720_v18 = vmul.f32 %v1768_v46, %v660_v14  ;;  %v442_v5 = vpop.permute.xlu0 %441 }
 0x11b   : > { %v519_v62 = vmul.f32 %v1693_v9, %v442_v5 }
 0x11c   : > { %v1817_v0 = vadd.f32 %v720_v18, %v636_v61 }
 0x11d   : > { %v535_v22 = vadd.f32 %v519_v62, %v1613_v24  ;;  %v668_v21 = vpop.permute.xlu1 %667  ;;  %v725_v62 = vmul.f32 %v1768_v46, %v1745_v45  ;;  %v727_v45 = vmul.f32 %v1768_v46, %v1753_v59  ;;  %v631_v59 = vmul.f32 %v1685_v54, %v1803_v34 }
 0x11e   : > { %v722_v3 = vmul.f32 %v1768_v46, %v668_v21  ;;  %v452_v12 = vpop.permute.xlu0 %451 }
 0x11f   : > { %v635_v47 = vadd.f32 %v619_v16, %v535_v22  ;;  %v521_v50 = vmul.f32 %v1693_v9, %v452_v12  ;;  %v828_v22 = vmul.f32 %v1782_v28, %v1687_v58  ;;  %v629_v58 = vmul.f32 %v1685_v54, %v1798_v56 }
 0x120   : > { %v1826_v29 = vadd.f32 %v722_v3, %v1707_v30  ;;  %v821_v30 = vmul.f32 %v1782_v28, %v1674_v23  ;;  %v625_v23 = vmul.f32 %v1685_v54, %v580_v35  ;;  %v627_v35 = vmul.f32 %v1685_v54, %v1795_v44 }
 0x121   : > { %v537_v7 = vadd.f32 %v521_v50, %v372_v42  ;;  %v676_v10 = vpop.permute.xlu1 %675  ;;  %v735_v61 = vadd.f32 %v719_v37, %v635_v47 }
 0x122   : > { %v724_v26 = vmul.f32 %v1768_v46, %v676_v10  ;;  %v462_v24 = vpop.permute.xlu0 %461 }
 0x123   : > { %v637_v4 = vadd.f32 %v621_v2, %v537_v7  ;;  %v523_v27 = vmul.f32 %v1693_v9, %v462_v24 }
 0x124   : > { %v1834_v39 = vadd.f32 %v724_v26, %v1720_v53 }
 0x125   : > { %v539_v33 = vadd.f32 %v523_v27, %v382_v63  ;;  %v684_v17 = vpop.permute.xlu1 %683  ;;  %v737_v42 = vadd.f32 %v721_v57, %v637_v4 }
 0x126   : > { %v726_v49 = vmul.f32 %v1768_v46, %v684_v17  ;;  %v472_v20 = vpop.permute.xlu0 %471  ;;  %v633_v17 = vmul.f32 %v1685_v54, %v1809_v48 }
 0x127   : > { %v639_v1 = vadd.f32 %v623_v8, %v539_v33  ;;  %v525_v36 = vmul.f32 %v1693_v9, %v472_v20  ;;  %v837_v13 = vadd.f32 %v821_v30, %v737_v42  ;;  %v850_v33 = vmax.f32 %v1792_v40, 0.0 }
 0x128   : > { %v1844_v53 = vadd.f32 %v726_v49, %v1732_v60 }
 0x129   : > { %v541_v14 = vadd.f32 %v525_v36, %v392_v38  ;;  %v692_v6 = vpop.permute.xlu1 %691  ;;  %v739_v63 = vadd.f32 %v723_v15, %v639_v1 }
 0x12a   : > { %v728_v18 = vmul.f32 %v1768_v46, %v692_v6  ;;  %v482_v5 = vpop.permute.xlu0 %481  ;;  %v853_v6 = vmax.f32 %v837_v13, 0.0 }
 0x12b   : > { %v641_v16 = vadd.f32 %v625_v23, %v541_v14  ;;  %v527_v25 = vmul.f32 %v1693_v9, %v482_v5 }
 0x12c   : > { %v744_v60 = vadd.f32 %v728_v18, %v1743_v43 }
 0x12d   : > { %v543_v38 = vadd.f32 %v527_v25, %v402_v51  ;;  %v1856_v21 = vadd.f32 %v725_v62, %v641_v16 }
 0x12e   : > { %v492_v3 = vpop.permute.xlu0 %491  ;;  %v756_v12 = vpop.permute.xlu1 %755  ;;  %v1858_v37 = vadd.f32 %v828_v22, %v744_v60 }
 0x12f   : > { %v643_v47 = vadd.f32 %v627_v35, %v543_v38  ;;  %v529_v50 = vmul.f32 %v1693_v9, %v492_v3  ;;  %v819_v44 = vmul.f32 %v1782_v28, %v756_v12 }
 0x131   : > { %v545_v43 = vadd.f32 %v529_v50, %v1807_v31  ;;  %v1866_v2 = vadd.f32 %v727_v45, %v643_v47  ;;  %v835_v4 = vadd.f32 %v819_v44, %v735_v61  ;;  %v731_v31 = vmul.f32 %v1768_v46, %v1765_v32 }
 0x132   : > { %v502_v51 = vpop.permute.xlu0 %501  ;;  %v760_v7 = vpop.permute.xlu1 %759 }
 0x133   : > { %v531_v10 = vmul.f32 %v1693_v9, %v502_v51  ;;  %v645_v26 = vadd.f32 %v629_v58, %v545_v43  ;;  %v820_v57 = vmul.f32 %v1782_v28, %v760_v7  ;;  %v851_v49 = vmax.f32 %v835_v4, 0.0 }
 0x135   : > { %v547_v24 = vadd.f32 %v531_v10, %v1811_v55  ;;  %v836_v34 = vadd.f32 %v820_v57, %v1817_v0 }
 0x136   : > { %v512_v56 = vpop.permute.xlu0 %511  ;;  %v768_v27 = vpop.permute.xlu1 %767 }
 0x137   : > { %v647_v30 = vadd.f32 %v631_v59, %v547_v24  ;;  %v533_v8 = vmul.f32 %v1693_v9, %v512_v56  ;;  %v822_v9 = vmul.f32 %v1782_v28, %v768_v27  ;;  %v852_v36 = vmax.f32 %v836_v34, 0.0 }
 0x139   : > { %v549_v55 = vadd.f32 %v533_v8, %v1813_v41  ;;  %v1882_v42 = vadd.f32 %v731_v31, %v647_v30  ;;  %v838_v48 = vadd.f32 %v822_v9, %v1826_v29 }
 0x13a   : > { %v869_v61 = vpop.permute.xlu0 %868 }
 0x13b   : > { %v946_v20 = vmul.f32 %v869_v61, %v850_v33  ;;  %v874_v15 = vpop.permute.xlu1 %873  ;;  %v1884_v1 = vadd.f32 %v633_v17, %v549_v55  ;;  %v854_v60 = vmax.f32 %v838_v48, 0.0 }
 0x13c   : > { %v947_v32 = vmul.f32 %v874_v15, %v851_v49 }
 0x13e   : > { %v962_v40 = vadd.f32 %v947_v32, %v946_v20  ;;  %v879_v23 = vpop.permute.xlu0 %878 }
 0x13f   : > { %v948_v14 = vmul.f32 %v879_v23, %v852_v36 }
 0x140   : > { %v772_v54 = vpop.permute.xlu1 %771 }
 0x141   : > { %v963_v0 = vadd.f32 %v962_v40, %v948_v14  ;;  %v823_v41 = vmul.f32 %v1782_v28, %v772_v54  ;;  %v860_v54 = vmax.f32 %v1858_v37, 0.0 }
 0x142   : > { %v884_v18 = vpop.permute.xlu0 %883 }
 0x143   : > { %v949_v5 = vmul.f32 %v884_v18, %v853_v6  ;;  %v839_v16 = vadd.f32 %v823_v41, %v739_v63 }
 0x144   : > { %v776_v62 = vpop.permute.xlu1 %775 }
 0x145   : > { %v964_v25 = vadd.f32 %v963_v0, %v949_v5  ;;  %v824_v22 = vmul.f32 %v1782_v28, %v776_v62  ;;  %v855_v47 = vmax.f32 %v839_v16, 0.0 }
 0x146   : > { %v889_v35 = vpop.permute.xlu0 %888 }
 0x147   : > { %v950_v38 = vmul.f32 %v889_v35, %v854_v60  ;;  %v840_v12 = vadd.f32 %v824_v22, %v1834_v39  ;;  %v829_v39 = vmul.f32 %v1782_v28, %v1697_v19 }
 0x148   : > { %v780_v3 = vpop.permute.xlu1 %779 }
 0x149   : > { %v965_v45 = vadd.f32 %v964_v25, %v950_v38  ;;  %v856_v13 = vmax.f32 %v840_v12, 0.0  ;;  %v825_v63 = vmul.f32 %v1782_v28, %v780_v3 }
 0x14a   : > { %v894_v29 = vpop.permute.xlu0 %893 }
 0x14b   : > { %v951_v50 = vmul.f32 %v894_v29, %v855_v47  ;;  %v841_v59 = vadd.f32 %v825_v63, %v1856_v21 }
 0x14c   : > { %v784_v58 = vpop.permute.xlu1 %783 }
 0x14d   : > { %v966_v43 = vadd.f32 %v965_v45, %v951_v50  ;;  %v857_v56 = vmax.f32 %v841_v59, 0.0  ;;  %v826_v30 = vmul.f32 %v1782_v28, %v784_v58 }
 0x14e   : > { %v899_v44 = vpop.permute.xlu0 %898 }
 0x14f   : > { %v952_v51 = vmul.f32 %v899_v44, %v856_v13  ;;  %v842_v17 = vadd.f32 %v826_v30, %v1844_v53 }
 0x150   : > { %v788_v7 = vpop.permute.xlu1 %787 }
 0x151   : > { %v967_v10 = vadd.f32 %v966_v43, %v952_v51  ;;  %v858_v55 = vmax.f32 %v842_v17, 0.0  ;;  %v827_v21 = vmul.f32 %v1782_v28, %v788_v7 }
 0x152   : > { %v919_v19 = vpop.permute.xlu0 %918 }
 0x153   : > { %v956_v41 = vmul.f32 %v919_v19, %v860_v54 }
 0x155   : > { %v696_v24 = vpop.permute.xlu1 %695 }
 0x156   : > { %v729_v57 = vmul.f32 %v1768_v46, %v696_v24  ;;  %v924_v53 = vpop.permute.xlu0 %923 }
 0x158   : > { %v745_v4 = vadd.f32 %v729_v57, %v645_v26  ;;  %v843_v26 = vadd.f32 %v827_v21, %v1866_v2 }
 0x15a   : > { %v845_v27 = vadd.f32 %v829_v39, %v745_v4  ;;  %v904_v31 = vpop.permute.xlu1 %903  ;;  %v859_v23 = vmax.f32 %v843_v26, 0.0  ;;  %v929_v2 = vpop.permute.xlu0 %928 }
 0x15b   : > { %v953_v8 = vmul.f32 %v904_v31, %v857_v56 }
 0x15c   : > { %v861_v48 = vmax.f32 %v845_v27, 0.0 }
 0x15d   : > { %v968_v33 = vadd.f32 %v967_v10, %v953_v8 }
 0x15e   : > { %v957_v5 = vmul.f32 %v924_v53, %v861_v48  ;;  %v939_v7 = vpop.permute.xlu0 %938 }
 0x15f   : > { %v700_v34 = vpop.permute.xlu1 %699 }
 0x160   : > { %v730_v20 = vmul.f32 %v1768_v46, %v700_v34 }
 0x162   : > { %v746_v36 = vadd.f32 %v730_v20, %v1751_v11  ;;  %v986_v27 = vpop.permute.xlu0 %985 }
 0x164   : > { %v909_v61 = vpop.permute.xlu1 %908 }
 0x165   : > { %v954_v49 = vmul.f32 %v909_v61, %v858_v55 }
 0x167   : > { %v969_v15 = vadd.f32 %v968_v33, %v954_v49 }
 0x169   : > { %v800_v32 = vpop.permute.xlu1 %799 }
 0x16a   : > { %v830_v9 = vmul.f32 %v1782_v28, %v800_v32 }
 0x16c   : > { %v846_v40 = vadd.f32 %v830_v9, %v746_v36 }
 0x16e   : > { %v914_v14 = vpop.permute.xlu1 %913  ;;  %v862_v6 = vmax.f32 %v846_v40, 0.0 }
 0x16f   : > { %v955_v0 = vmul.f32 %v914_v14, %v859_v23 }
 0x170   : > { %v958_v25 = vmul.f32 %v929_v2, %v862_v6 }
 0x171   : > { %v970_v18 = vadd.f32 %v969_v15, %v955_v0 }
 0x173   : > { %v971_v62 = vadd.f32 %v970_v18, %v956_v41  ;;  %v804_v16 = vpop.permute.xlu1 %803 }
 0x174   : > { %v831_v11 = vmul.f32 %v1782_v28, %v804_v16 }
 0x175   : > { %v972_v22 = vadd.f32 %v971_v62, %v957_v5 }
 0x176   : > { %v847_v12 = vadd.f32 %v831_v11, %v1882_v42 }
 0x177   : > { %v973_v60 = vadd.f32 %v972_v22, %v958_v25 }
 0x178   : > { %v712_v35 = vpop.permute.xlu1 %711  ;;  %v863_v13 = vmax.f32 %v847_v12, 0.0 }
 0x179   : > { %v733_v37 = vmul.f32 %v1768_v46, %v712_v35 }
 0x17b   : > { %v749_v50 = vadd.f32 %v733_v37, %v1884_v1 }
 0x17d   : > { %v808_v38 = vpop.permute.xlu1 %807 }
 0x17e   : > { %v832_v3 = vmul.f32 %v1782_v28, %v808_v38 }
 0x180   : > { %v848_v45 = vadd.f32 %v832_v3, %v1776_v52 }
 0x181   : > { %v812_v47 = vpop.permute.xlu1 %811 }
 0x182   : > { %v833_v29 = vmul.f32 %v1782_v28, %v812_v47  ;;  %v864_v58 = vmax.f32 %v848_v45, 0.0 }
 0x184   : > { %v849_v43 = vadd.f32 %v833_v29, %v749_v50  ;;  %v960_v63 = vmul.f32 %v939_v7, %v864_v58 }
 0x186   : > { %v934_v44 = vpop.permute.xlu1 %933  ;;  %v865_v59 = vmax.f32 %v849_v43, 0.0 }
 0x187   : > { %v959_v51 = vmul.f32 %v934_v44, %v863_v13 }
 0x189   : > { %v974_v10 = vadd.f32 %v973_v60, %v959_v51 }
 0x18a   : > { %v944_v24 = vpop.permute.xlu1 %943 }
 0x18b   : > { %v961_v46 = vmul.f32 %v944_v24, %v865_v59  ;;  %v975_v57 = vadd.f32 %v974_v10, %v960_v63 }
 0x18d   : > { %v976_v42 = vadd.f32 %v975_v57, %v961_v46 }
 0x18f   : > { %v977_v52 = vrot.slane %v976_v42, 4 }
 0x191   : > { %v978_v39 = vadd.f32 %v977_v52, %v976_v42 }
 0x193   : > { %v979_v28 = vrot.slane %v978_v39, 2 }
 0x195   : > { %v980_v4 = vadd.f32 %v979_v28, %v978_v39 }
 0x197   : > { %v981_v1 = vrot.slane %v980_v4, 1 }
 0x199   : > { %v982_v56 = vadd.f32 %v981_v1, %v980_v4 }
 0x19b   : > { %v988_v31 = vadd.f32 %v986_v27, %v982_v56 }
 0x19d   : > { %v989_v30 = vand.u32 2147483647, %v988_v31  ;;  %vm997_vm0 = vcmp.ge.f32.partialorder %v988_v31, 0.0 }
 0x19f   : > { %v990_v8 = vsub.f32 0.0, %v989_v30 }
 0x1a1   : > { %v991_v33 = vmul.f32 1.442695, %v990_v8 }
 0x1a3   : > { %1149 = vpow2.f32 %v991_v33 }
 0x1b0   : > { %v1150_v17 = vpop.eup %1149 }
 0x1b1   : > { %v993_v34 = vadd.f32 1.0, %v1150_v17 }
 0x1b3   : > { %1151 = vrcp.f32 %v993_v34 }
 0x1c0   : > { %v1152_v55 = vpop.eup %1151 }
 0x1c1   : > { %v996_v61 = vmul.f32 %v1152_v55, %v1150_v17 }
 0x1c3   : > { %v998_v21 = vsel %vm997_vm0, %v1152_v55, %v996_v61  ;;  %v999_v49 = vsel %vm997_vm0, %v996_v61, %v1152_v55 }
 0x1c4   : > { %1000 = vst [vmem:[%s215_s17] sm:$0x1] %v998_v21  ;;  %1001 = vst [vmem:[%s215_s17 + $0x1] sm:$0x1] %v999_v49 }
 0x1c5   : > { %1166 = shalt.err (!%p1163_p3)
}
 0x1c6   : > { %s1167_s11 = scalar_lea.hbm %s1916_s30, 32  ;;  %s1171_s14 = scalar_lea.hbm %s1962_s5, 64 }
 0x1c7   : > { %p1168_p4 = scmp.ne.s32.totalorder %s1916_s30, %s1167_s11  ;;  %p1172_p9 = scmp.lt.s32.totalorder %s1916_s30, %s1962_s5 }
 0x1c8   : > { %p1173_p10 = scmp.lt.s32.totalorder %s1171_s14, %s1167_s11 }
 0x1c9   : > { %p1169_p7 = pnand %p1168_p4, %p1289_p5 }
 0x1ca   : > { %p1174_p11 = por %p1173_p10, %p1172_p9 }
 0x1cb   : > { %p1170_p8 = pneg %p1169_p7 }
 0x1cd   : > { %p1175_p12 = pnand %p1174_p11, %p1170_p8 }
 0x1cf   : > { %1178 = shalt.err (!%p1175_p12)
}
 0x1d0   : > { %1085 = dma.vmem_to_hbm [thread:$0]  (%p1289_p5), %s1918_s23, 32, %s1916_s30, %s1003_s22  }
 0x1d1 PF: > { %p1091_p13 = scmp.ge.s32.totalorder %s1213_s21, 2  ;;  %s1028_s16 = sand.u32 1, %s1201_s18  }
 0x1d2   : > { %s1029_s17 = scalar_lea.sflag [#allocation3], %s1028_s16 }
 0x1d3   : > { %p1088_p0 = pnand %p1091_p13, %p1293_p6 }
 0x1d5   : > { %p1089_p1 = pneg %p1088_p0 }
 0x1d7   : > { %1196 = dma.done.wait (%p1089_p1), %s1029_s17, 32  }
 0x1d8   : > { %1198 = vsyncadd (%p1089_p1), %s1029_s17, 4294967264  ;;  %p15_p2 = scmp.ge.s32.totalorder %s1276_s24, 4   ;;  %s1965_s18 = smov %s1205_s19 }
 0x1d9   : > { %s1966_s19 = smov %s1209_s20  ;;  %s1967_s20 = smov %s1287_s27 }
 0x1da   : > { %s1968_s21 = smov %s1276_s24  ;;  %17 = sbr.rel (!%p15_p2) target bundleno = 3 (0x3), region = 75 }
 0x1df   :  { %1034 = vsyncpa [#allocation3], 1 }
 0x1e0   :  { %1036 = vsyncpa [#allocation3 + $0x1], 1 }

</bundles_post_ra>
